<compile_context>
chip_gen: v6e
topology: v6e:2x2x1
jax: 0.10.0
libtpu: 0.0.40
codegen_flags: <defaults>
</compile_context>

<pallas_src>
import jax
import jax.numpy as jnp
from jax.experimental import pallas as pl
from jax.experimental.pallas import tpu as pltpu


def en_kernel(adj_ref, x_ref, u_ref, v_ref, out_ref):
    adj = adj_ref[...]                        # [G, N, N]
    x = x_ref[...]                            # [G, N, 1]
    u = u_ref[...]                            # [1, H]   (= relu(w1^T) @ w4^T)
    v = v_ref[...]                            # [1, H]   (= relu(-w1^T) @ w4^T)

    # s = adj @ x  — contract first (skinny batched matvec), no [N, H] expansion.
    s = jnp.einsum('gij,gjk->gik', adj, x,
                   preferred_element_type=jnp.float32)                     # [G, N, 1]

    # Exact rank-2 split of relu(s (x) w1^T): relu(s)*relu(w) + relu(-s)*relu(-w).
    p = jnp.maximum(s, 0.0)                                                # [G, N, 1]
    m = jnp.maximum(-s, 0.0)                                               # [G, N, 1]

    # adj @ relu(+-s): two more skinny batched matvecs on the otherwise-idle MXU.
    a = jnp.einsum('gij,gjk->gik', adj, p,
                   preferred_element_type=jnp.float32)                     # [G, N, 1]
    b = jnp.einsum('gij,gjk->gik', adj, m,
                   preferred_element_type=jnp.float32)                     # [G, N, 1]

    # h2 = relu((adj @ h1) @ w4^T) = relu(a (x) u + b (x) v) — pure VPU broadcast MAD.
    h2 = jnp.maximum(a * u + b * v, 0.0)                                   # [G, N, H]
    out_ref[...] = h2.astype(out_ref.dtype)


def en_forward_batched(x, adj, w1, w4, graphs_per_step=None):
    """Batched forward.

    x:   [B, N, 1]   node features per graph
    adj: [B, N, N]   dense adjacency per graph
    w1:  [H, 1]      gc1.weight (PyTorch Linear layout)
    w4:  [H, H]      gc4.weight (PyTorch Linear layout)
    returns [B, N, H]
    """
    B, N, _ = x.shape
    H = w1.shape[0]

    # Rank-2 precompute (float32, independent of x.dtype). These row vectors fold the
    # entire [N,H]@[H,H] layer-2 matmul; padded/extra columns never exist, so the
    # kernel writes exactly [B, N, H] (no external slice needed).
    w1t = w1.astype(jnp.float32).reshape(1, H)          # [1, H]  (w1 is [H, 1])
    w4t = w4.astype(jnp.float32).T                      # [H, H]
    u = (jnp.maximum(w1t, 0.0) @ w4t).astype(x.dtype)   # [1, H]
    v = (jnp.maximum(-w1t, 0.0) @ w4t).astype(x.dtype)  # [1, H]

    # Process G graphs per grid step: amortizes per-step overhead and merges DMAs,
    # while keeping >=2 steps (when possible) so both TCs of a 2-core chip get work.
    if graphs_per_step is None:
        graphs_per_step = B // 2 if (B >= 2 and B % 2 == 0) else B
    G = graphs_per_step
    assert B % G == 0, (B, G)
    steps = B // G

    return pl.pallas_call(
        en_kernel,
        out_shape=jax.ShapeDtypeStruct((B, N, H), x.dtype),
        grid=(steps,),
        in_specs=[
            pl.BlockSpec((G, N, N), lambda b: (b, 0, 0)),   # adj  (G graphs / step)
            pl.BlockSpec((G, N, 1), lambda b: (b, 0, 0)),   # x    (G graphs / step)
            pl.BlockSpec((1, H), lambda b: (0, 0)),         # u    (resident in VMEM)
            pl.BlockSpec((1, H), lambda b: (0, 0)),         # v    (resident in VMEM)
        ],
        out_specs=pl.BlockSpec((G, N, H), lambda b: (b, 0, 0)),
        compiler_params=pltpu.CompilerParams(
            dimension_semantics=(pltpu.PARALLEL,),
        ),
    )(adj, x, u, v)


def en_forward(x, adj, w1, w4):
    """Single-graph forward matching the PyTorch module: x [N,1], adj [N,N]."""
    return en_forward_batched(x[None], adj[None], w1, w4)[0]


def _init_linear_weight(key, out_features, in_features):
    # Stand-in for PyTorch kaiming-uniform: U(-b, b), b = 1/sqrt(fan_in)
    bound = 1.0 / jnp.sqrt(jnp.float32(in_features))
    return jax.random.uniform(
        key, (out_features, in_features), jnp.float32, minval=-bound, maxval=bound
    )


def _en_ref(x, adj, w1, w4):
    # Pure-JAX reference in the original association order.
    h1 = jnp.maximum((adj @ x) @ w1.T, 0.0)
    return jnp.maximum((adj @ h1) @ w4.T, 0.0)


if __name__ == "__main__":
    B = 8           # batched independent graphs
    N = 16          # nodes per graph
    H = 32          # hidden_channels

    key = jax.random.PRNGKey(0)
    k_x, k_adj, k_w1, k_w4 = jax.random.split(key, 4)

    x = jax.random.normal(k_x, (B, N, 1), jnp.float32)
    adj = jax.random.normal(k_adj, (B, N, N), jnp.float32)
    w1 = _init_linear_weight(k_w1, H, 1)   # gc1.weight: [H, 1]
    w4 = _init_linear_weight(k_w4, H, H)   # gc4.weight: [H, H]

    out = en_forward_batched(x, adj, w1, w4)
    out = jax.block_until_ready(out)
    assert out.shape == (B, N, H), out.shape

    ref = jax.vmap(lambda xb, ab: _en_ref(xb, ab, w1, w4))(x, adj)
    assert jnp.allclose(out, ref, atol=2e-3, rtol=2e-3), "batched mismatch vs reference"

    # Single-graph path (matches the PyTorch module signature).
    out1 = jax.block_until_ready(en_forward(x[0], adj[0], w1, w4))
    assert out1.shape == (N, H), out1.shape
    assert jnp.allclose(out1, ref[0], atol=2e-3, rtol=2e-3), "single-graph mismatch"

    print("KERNEL_OK")
</pallas_src>

<mosaic_0001>
module attributes {stable_mosaic.version = 11 : i64} {
  func.func @en_kernel(%arg0: i32, %arg1: memref<4x16x16xf32, #tpu.memory_space<vmem>>, %arg2: memref<4x16x1xf32, #tpu.memory_space<vmem>>, %arg3: memref<1x32xf32, #tpu.memory_space<vmem>>, %arg4: memref<1x32xf32, #tpu.memory_space<vmem>>, %arg5: memref<4x16x32xf32, #tpu.memory_space<vmem>>) attributes {dimension_semantics = [#tpu.dimension_semantics<parallel>], iteration_bounds = array<i64: 2>, scalar_prefetch = 0 : i64, scratch_operands = 0 : i64, tpu.core_type = #tpu.core_type<tc>, window_params = [{transform_indices = @transform_0, window_bounds = array<i64: 4, 16, 16>}, {transform_indices = @transform_1, window_bounds = array<i64: 4, 16, 1>}, {pipeline_mode = #tpu.pipeline_mode<synchronous>, transform_indices = @transform_2, window_bounds = array<i64: 1, 32>}, {pipeline_mode = #tpu.pipeline_mode<synchronous>, transform_indices = @transform_3, window_bounds = array<i64: 1, 32>}, {transform_indices = @transform_4, window_bounds = array<i64: 4, 16, 32>}]} {
    %c0 = arith.constant 0 : index
    %c0_0 = arith.constant 0 : index
    %c0_1 = arith.constant 0 : index
    %0 = vector.load %arg1[%c0, %c0_0, %c0_1] : memref<4x16x16xf32, #tpu.memory_space<vmem>>, vector<4x16x16xf32>
    %c0_2 = arith.constant 0 : index
    %c0_3 = arith.constant 0 : index
    %c0_4 = arith.constant 0 : index
    %1 = vector.load %arg2[%c0_2, %c0_3, %c0_4] : memref<4x16x1xf32, #tpu.memory_space<vmem>>, vector<4x16x1xf32>
    %c0_5 = arith.constant 0 : index
    %c0_6 = arith.constant 0 : index
    %2 = vector.load %arg3[%c0_5, %c0_6] : memref<1x32xf32, #tpu.memory_space<vmem>>, vector<1x32xf32>
    %c0_7 = arith.constant 0 : index
    %c0_8 = arith.constant 0 : index
    %3 = vector.load %arg4[%c0_7, %c0_8] : memref<1x32xf32, #tpu.memory_space<vmem>>, vector<1x32xf32>
    "tpu.trace_start"() <{level = 10 : i32, message = "gij,gjk->gik"}> : () -> ()
    %cst = arith.constant dense<0.000000e+00> : vector<4x16x1xf32>
    %4 = tpu.matmul %0, %1, %cst {dimension_numbers = #tpu.dot_dimension_numbers<[2], [1], [1], [2], [0, 0, 0, 1, 1, 2], [0], [0]>} : vector<4x16x16xf32>, vector<4x16x1xf32>, vector<4x16x1xf32> -> vector<4x16x1xf32>
    "tpu.trace_stop"() : () -> ()
    %cst_9 = arith.constant 0.000000e+00 : f32
    %5 = vector.broadcast %cst_9 : f32 to vector<4x16x1xf32>
    %6 = arith.maximumf %4, %5 : vector<4x16x1xf32>
    %cst_10 = arith.constant 0.000000e+00 : f32
    %7 = vector.broadcast %cst_10 : f32 to vector<4x16x1xf32>
    %8 = arith.subf %7, %4 : vector<4x16x1xf32>
    %cst_11 = arith.constant 0.000000e+00 : f32
    %9 = vector.broadcast %cst_11 : f32 to vector<4x16x1xf32>
    %10 = arith.maximumf %8, %9 : vector<4x16x1xf32>
    "tpu.trace_start"() <{level = 10 : i32, message = "gij,gjk->gik"}> : () -> ()
    %cst_12 = arith.constant dense<0.000000e+00> : vector<4x16x1xf32>
    %11 = tpu.matmul %0, %6, %cst_12 {dimension_numbers = #tpu.dot_dimension_numbers<[2], [1], [1], [2], [0, 0, 0, 1, 1, 2], [0], [0]>} : vector<4x16x16xf32>, vector<4x16x1xf32>, vector<4x16x1xf32> -> vector<4x16x1xf32>
    %cst_13 = arith.constant dense<0.000000e+00> : vector<4x16x1xf32>
    %12 = tpu.matmul %0, %10, %cst_13 {dimension_numbers = #tpu.dot_dimension_numbers<[2], [1], [1], [2], [0, 0, 0, 1, 1, 2], [0], [0]>} : vector<4x16x16xf32>, vector<4x16x1xf32>, vector<4x16x1xf32> -> vector<4x16x1xf32>
    "tpu.trace_stop"() : () -> ()
    %13 = vector.shape_cast %2 : vector<1x32xf32> to vector<1x1x32xf32>
    %14 = vector.broadcast %11 : vector<4x16x1xf32> to vector<4x16x32xf32>
    %15 = vector.broadcast %13 : vector<1x1x32xf32> to vector<4x16x32xf32>
    %16 = arith.mulf %14, %15 : vector<4x16x32xf32>
    %17 = vector.shape_cast %3 : vector<1x32xf32> to vector<1x1x32xf32>
    %18 = vector.broadcast %12 : vector<4x16x1xf32> to vector<4x16x32xf32>
    %19 = vector.broadcast %17 : vector<1x1x32xf32> to vector<4x16x32xf32>
    %20 = arith.mulf %18, %19 : vector<4x16x32xf32>
    %21 = arith.addf %16, %20 : vector<4x16x32xf32>
    %cst_14 = arith.constant 0.000000e+00 : f32
    %22 = vector.broadcast %cst_14 : f32 to vector<4x16x32xf32>
    %23 = arith.maximumf %21, %22 : vector<4x16x32xf32>
    %c0_15 = arith.constant 0 : index
    %c0_16 = arith.constant 0 : index
    %c0_17 = arith.constant 0 : index
    %24 = vector.load %arg5[%c0_15, %c0_16, %c0_17] : memref<4x16x32xf32, #tpu.memory_space<vmem>>, vector<4x16x32xf32>
    tpu.vector_store %arg5[%c0_15, %c0_16, %c0_17], %23 {strides = array<i32>} : memref<4x16x32xf32, #tpu.memory_space<vmem>>, vector<4x16x32xf32>,
    return
  }
  func.func @transform_0(%arg0: i32) -> (i32, i32, i32) {
    %c0_i32 = arith.constant 0 : i32
    %c0_i32_0 = arith.constant 0 : i32
    %c0_i32_1 = arith.constant 0 : i32
    return %arg0, %c0_i32, %c0_i32_0 : i32, i32, i32
  }
  func.func @transform_1(%arg0: i32) -> (i32, i32, i32) {
    %c0_i32 = arith.constant 0 : i32
    %c0_i32_0 = arith.constant 0 : i32
    %c0_i32_1 = arith.constant 0 : i32
    return %arg0, %c0_i32, %c0_i32_0 : i32, i32, i32
  }
  func.func @transform_2(%arg0: i32) -> (i32, i32) {
    %c0_i32 = arith.constant 0 : i32
    %c0_i32_0 = arith.constant 0 : i32
    %c0_i32_1 = arith.constant 0 : i32
    return %c0_i32, %c0_i32_0 : i32, i32
  }
  func.func @transform_3(%arg0: i32) -> (i32, i32) {
    %c0_i32 = arith.constant 0 : i32
    %c0_i32_0 = arith.constant 0 : i32
    %c0_i32_1 = arith.constant 0 : i32
    return %c0_i32, %c0_i32_0 : i32, i32
  }
  func.func @transform_4(%arg0: i32) -> (i32, i32, i32) {
    %c0_i32 = arith.constant 0 : i32
    %c0_i32_0 = arith.constant 0 : i32
    %c0_i32_1 = arith.constant 0 : i32
    return %arg0, %c0_i32, %c0_i32_0 : i32, i32, i32
  }
}

</mosaic_0001>

<bundles_post_ra>
// kernel: tpu_custom_call.1
= control target key start
LH: loop header
LB: loop body
LE: loop exit
PB: predicated region body
PF: predicated region fallthrough
CT: control target
= control target key end

     0   :  { %9 = vsyncpa [#allocation3], 0  ;;  %s1937_s0 = inlined_call_operand.vmem [shape: f32[8,16,16], index: 0, kind: input, shape index: {}]   ;;  %s1938_s1 = inlined_call_operand.vmem [shape: f32[8,16,1], index: 1, kind: input, shape index: {}]   ;;  %s1939_s2 = inlined_call_operand.vmem [shape: f32[1,32], index: 2, kind: input, shape index: {}]   ;;  %s1940_s3 = inlined_call_operand.vmem [shape: f32[1,32], index: 3, kind: input, shape index: {}]   ;;  %s1941_s4 = inlined_call_operand.hbm [shape: f32[8,16,32], index: 4, kind: output, shape index: {}]  }
   0x1   :  { %11 = vsyncpa [#allocation3 + $0x1], 0  ;;  %s1730_s15 = smov 0   ;;  %s1732_s16 = smov 0  }
   0x2   :  { %s1734_s17 = smov 0   ;;  %s1736_s18 = smov 0  }
   0x3 LB: > { %s1751_s19 = sadd.s32 4294967295, %s1699_s18   ;;  %s1416_s20 = sadd.s32 4294967294, %s1699_s18   ;;  %s1699_s18 = sphi %s1736_s18, %s1947_s18   ;;  %s1695_s17 = sphi %s1734_s17, %s1946_s17   ;;  %s1691_s16 = sphi %s1732_s16, %s1945_s16   ;;  %s1687_s15 = sphi %s1730_s15, %s1944_s15  }
   0x4   : > { %s1755_s21 = sadd.s32 1, %s1699_s18   ;;  %s118_s22 = sadd.s32 1, %s1695_s17 }
   0x5   : > { %s115_s23 = ssub.s32 %s1699_s18, %s1755_s21  ;;  %p128_p0 = scmp.ne.s32.totalorder %s1695_s17, %s1691_s16 }
   0x6   : > { %p116_p1 = scmp.eq.s32.totalorder %s115_s23, 0  ;;  %p129_p2 = scmp.eq.s32.totalorder %s1751_s19, 1 }
   0x7   : > { %p134_p3 = scmp.ne.s32.totalorder %s1691_s16, %s1687_s15  ;;  %p135_p4 = scmp.eq.s32.totalorder %s1416_s20, 1 }
   0x8   : > { %s1766_s24 = scalar_select %p116_p1, %s1695_s17, %s118_s22  }
   0x9   : > { %p1768_p5 = por %p129_p2, %p128_p0  ;;  %p1772_p6 = por %p135_p4, %p134_p3 }
   0xa   : > { %p1419_p7 = scmp.ge.s32.totalorder %s1699_s18, 1  ;;  %p179_p8 = scmp.lt.s32.totalorder %s1699_s18, 3 }
   0xc   : > { %p180_p9 = pnand %p1419_p7, %p179_p8 }
   0xd   : > { %s1421_s27 = sshll.u32 (!%p180_p9), %s1751_s19, 2  ;;  %s209_s13 = sand.u32 (!%p180_p9), 1, %s1691_s16  }
   0xe   : > { %183 = sbr.rel (%p180_p9) target bundleno = 593 (0x251), region = 36  ;;  %p213_p10 = scmp.lt.s32.totalorder (!%p180_p9), %s1421_s27, 7 }
   0xf   : > { %s1420_s14 = sshll.u32 (!%p180_p9), %s209_s13, 6  ;;  %s1462_s22 = sshll.u32 (!%p180_p9), %s1751_s19, 10 }
  0x10   : > { %s1868_s20 = scalar_lea.vmem (!%p180_p9), [#allocation2], %s1420_s14  ;;  %s1887_s29 = scalar_lea.hbm (!%p180_p9), %s1941_s4, %s1462_s22 }
  0x11   : > { %s1342_s23 = sshll.u32 (!%p180_p9), %s1868_s20, 4  ;;  %s1897_s19 = scalar_lea.sflag (!%p180_p9), [#allocation3], %s209_s13  ;;  %s1889_s23 = int_to_ptr.vmem [resolvable:$true] %s1342_s23 }
  0x12   : > { %s1639_s30 = scalar_lea.vmem (!%p180_p9), %s1889_s23, 1024 }
  0x13   : > { %s1949_s27 = smov (!%p213_p10, %s1421_s27), 7  ;;  %vm245_vm0 = vcmask 130048   ;;  %v1701_v16 = vmov 0   ;;  %vm1318_vm1 = vcmask 261120   ;;  %p1640_p11 = scmp.ne.s32.totalorder %s1889_s23, %s1639_s30 }
  0x14   : > { %s1459_s28 = sshll.u32 %s1949_s27, 4  ;;  %1638 = vset.pattern.permute.xlu1 %v1701_v16  ;;  %1637 = vset.pattern.permute.xlu0 %v1701_v16 }
  0x15   : > { %s224_s5 = scalar_lea.vmem %s1938_s1, %s1459_s28  ;;  %s1785_s8 = scalar_lea.vmem %s1937_s0, %s1459_s28 }
  0x16   : > { %v236_v0 = vld [vmem:[%s224_s5 + $0x8] sm:$0xff]  ;;  %v238_v1 = vld [vmem:[%s224_s5 + $0x18] sm:$0xff]  ;;  %v235_v2 = vld [vmem:[%s224_s5] sm:$0xff]  ;;  %p1641_p12 = pnand %p1640_p11, %p1768_p5 }
  0x17   : > { %1511 = vmatprep.subr.mxu0 %v236_v0  ;;  %1518 = vmatprep.subr.mxu1 %v238_v1  ;;  %v237_v3 = vld [vmem:[%s224_s5 + $0x10] sm:$0xff]  ;;  %v1788_v4 = vld [vmem:[%s1785_s8] sm:$0xff]  ;;  %v1794_v6 = vld [vmem:[%s1785_s8 + $0x8] sm:$0xff] }
  0x18   : > { %1512 = vmatpush3.msra.mxu0 %v236_v0  ;;  %1519 = vmatpush3.msra.mxu1 %v238_v1  ;;  %v1791_v5 = vld [vmem:[%s1785_s8 + $0x10] sm:$0xff]  ;;  %v1797_v7 = vld [vmem:[%s1785_s8 + $0x18] sm:$0xff]  ;;  %v240_v8 = vld [vmem:[%s224_s5 + $0x28] sm:$0xff]  ;;  %p1642_p13 = pneg %p1641_p12 }
  0x19   : > { %1513 = vmatprep.subr.mxu0 %v235_v2  ;;  %1520 = vmatprep.subr.mxu1 %v237_v3  ;;  %v242_v9 = vld [vmem:[%s224_s5 + $0x38] sm:$0xff]  ;;  %v239_v10 = vld [vmem:[%s224_s5 + $0x20] sm:$0xff]  ;;  %v241_v11 = vld [vmem:[%s224_s5 + $0x30] sm:$0xff]  ;;  %s1702_s5 = smov [#allocation2]  }
  0x1a   : > { %1514 = vmatpush3.msra.mxu0 %v235_v2  ;;  %1515 = vmatprep.mubr.msk.f32.mxu0 %vm245_vm0, %v1788_v4  ;;  %v1808_v12 = vld [vmem:[%s1785_s8 + $0x20] sm:$0xff]  ;;  %v1811_v13 = vld [vmem:[%s1785_s8 + $0x30] sm:$0xff]  ;;  %v1814_v14 = vld [vmem:[%s1785_s8 + $0x28] sm:$0xff]  ;;  %s1643_s6 = sshll.u32 %s1702_s5, 4  ;;  %s1644_s6 = int_to_ptr.vmem [resolvable:$false] %s1643_s6 }
  0x1b   : > { %1521 = vmatpush3.msra.mxu1 %v237_v3  ;;  %1522 = vmatprep.mubr.msk.f32.mxu1 %vm245_vm0, %v1791_v5  ;;  %v1817_v15 = vld [vmem:[%s1785_s8 + $0x38] sm:$0xff]  ;;  %s1645_s7 = scalar_lea.vmem %s1644_s6, 2048  ;;  %p1646_p0 = scmp.lt.s32.totalorder %s1889_s23, %s1644_s6 }
  0x1c   : > { %1516 = vmatmul.mubr.msk.f32.vlgmr.msra.gmra.mxu0 %vm245_vm0, %v1794_v6  ;;  %1523 = vmatmul.mubr.msk.f32.vlgmr.msra.gmra.mxu1 %vm245_vm0, %v1797_v7  ;;  %p1647_p1 = scmp.lt.s32.totalorder %s1645_s7, %s1639_s30 }
  0x1d   : > { %1525 = vmatprep.subr.mxu0 %v240_v8  ;;  %1532 = vmatprep.subr.mxu1 %v242_v9 }
  0x1e   : > { %1526 = vmatpush3.msra.mxu0 %v240_v8  ;;  %1533 = vmatpush3.msra.mxu1 %v242_v9  ;;  %v1451_v9 = vld [vmem:[%s1939_s2] ss:$0 sm:$0xff]  ;;  %p1648_p2 = por %p1647_p1, %p1646_p0 }
  0x1f   : > { %1527 = vmatprep.subr.mxu0 %v239_v10  ;;  %1534 = vmatprep.subr.mxu1 %v241_v11 }
  0x20   : > { %1528 = vmatpush3.msra.mxu0 %v239_v10  ;;  %1529 = vmatprep.mubr.msk.f32.mxu0 %vm245_vm0, %v1808_v12  ;;  %v1452_v10 = vld [vmem:[%s1940_s3] ss:$0 sm:$0xff]  ;;  %p1649_p3 = pnand %p1648_p2, %p1642_p13 }
  0x21   : > { %1535 = vmatpush3.msra.mxu1 %v241_v11  ;;  %1536 = vmatprep.mubr.msk.f32.mxu1 %vm245_vm0, %v1811_v13 }
  0x22   : > { %1530 = vmatmul.mubr.msk.f32.vlgmr.msra.gmra.mxu0 %vm245_vm0, %v1814_v14  ;;  %1537 = vmatmul.mubr.msk.f32.vlgmr.msra.gmra.mxu1 %vm245_vm0, %v1817_v15 }
  0x23   : > { %1543 = vmatprep.mubr.msk.f32.mxu0 %vm245_vm0, %v1788_v4  ;;  %1550 = vmatprep.mubr.msk.f32.mxu1 %vm245_vm0, %v1791_v5 }
  0xdc   : > { %v1517_v17 = vpop.f32.mrf.mxu0  ;;  %v1524_v18 = vpop.f32.mrf.mxu1 }
  0xdd   : > { %v571_v19 = vmax.f32 %v1517_v17, 0.0  ;;  %v573_v20 = vmax.f32 %v1524_v18, 0.0  ;;  %v579_v27 = vsub.f32 0.0, %v1517_v17  ;;  %v581_v30 = vsub.f32 0.0, %v1524_v18 }
  0xde   : > { %v318_v21 = vpop.f32.mrf.mxu0  ;;  %v399_v22 = vpop.f32.mrf.mxu1 }
  0xdf   : > { %v570_v23 = vmax.f32 %v318_v21, 0.0  ;;  %1539 = vmatprep.subr.mxu0 %v571_v19  ;;  %1546 = vmatprep.subr.mxu1 %v573_v20  ;;  %v572_v24 = vmax.f32 %v399_v22, 0.0  ;;  %v578_v34 = vsub.f32 0.0, %v318_v21  ;;  %v587_v36 = vmax.f32 %v579_v27, 0.0 }
  0xe0   : > { %1540 = vmatpush3.msra.mxu0 %v571_v19  ;;  %1547 = vmatpush3.msra.mxu1 %v573_v20  ;;  %v580_v37 = vsub.f32 0.0, %v399_v22  ;;  %v589_v38 = vmax.f32 %v581_v30, 0.0 }
  0xe1   : > { %1541 = vmatprep.subr.mxu0 %v570_v23  ;;  %1548 = vmatprep.subr.mxu1 %v572_v24  ;;  %v586_v41 = vmax.f32 %v578_v34, 0.0 }
  0xe2   : > { %v1531_v25 = vpop.f32.mrf.mxu0  ;;  %v1538_v26 = vpop.f32.mrf.mxu1  ;;  %1542 = vmatpush3.msra.mxu0 %v570_v23  ;;  %1549 = vmatpush3.msra.mxu1 %v572_v24  ;;  %v588_v42 = vmax.f32 %v580_v37, 0.0 }
  0xe3   : > { %v575_v28 = vmax.f32 %v1531_v25, 0.0  ;;  %v577_v29 = vmax.f32 %v1538_v26, 0.0  ;;  %1544 = vmatmul.mubr.msk.f32.vlgmr.msra.gmra.mxu0 %vm245_vm0, %v1794_v6  ;;  %1551 = vmatmul.mubr.msk.f32.vlgmr.msra.gmra.mxu1 %vm245_vm0, %v1797_v7  ;;  %v585_v39 = vsub.f32 0.0, %v1538_v26  ;;  %v583_v40 = vsub.f32 0.0, %v1531_v25 }
  0xe4   : > { %v480_v31 = vpop.f32.mrf.mxu0  ;;  %v561_v32 = vpop.f32.mrf.mxu1  ;;  %1557 = vmatprep.mubr.msk.f32.mxu0 %vm245_vm0, %v1808_v12  ;;  %1564 = vmatprep.mubr.msk.f32.mxu1 %vm245_vm0, %v1811_v13 }
  0xe5   : > { %v574_v33 = vmax.f32 %v480_v31, 0.0  ;;  %1553 = vmatprep.subr.mxu0 %v575_v28  ;;  %1560 = vmatprep.subr.mxu1 %v577_v29  ;;  %v576_v35 = vmax.f32 %v561_v32, 0.0  ;;  %v593_v43 = vmax.f32 %v585_v39, 0.0  ;;  %v582_v44 = vsub.f32 0.0, %v480_v31 }
  0xe6   : > { %1554 = vmatpush3.msra.mxu0 %v575_v28  ;;  %1561 = vmatpush3.msra.mxu1 %v577_v29  ;;  %v591_v45 = vmax.f32 %v583_v40, 0.0  ;;  %v584_v46 = vsub.f32 0.0, %v561_v32 }
  0xe7   : > { %1555 = vmatprep.subr.mxu0 %v574_v33  ;;  %1562 = vmatprep.subr.mxu1 %v576_v35  ;;  %v590_v47 = vmax.f32 %v582_v44, 0.0 }
  0xe8   : > { %1556 = vmatpush3.msra.mxu0 %v574_v33  ;;  %1563 = vmatpush3.msra.mxu1 %v576_v35  ;;  %v592_v48 = vmax.f32 %v584_v46, 0.0 }
  0xe9   : > { %1567 = vmatprep.subr.mxu0 %v587_v36  ;;  %1574 = vmatprep.subr.mxu1 %v589_v38 }
  0xea   : > { %1558 = vmatmul.mubr.msk.f32.vlgmr.msra.gmra.mxu0 %vm245_vm0, %v1814_v14  ;;  %1565 = vmatmul.mubr.msk.f32.vlgmr.msra.gmra.mxu1 %vm245_vm0, %v1817_v15 }
  0xeb   : > { %1568 = vmatpush3.msra.mxu0 %v587_v36  ;;  %1575 = vmatpush3.msra.mxu1 %v589_v38 }
  0xec   : > { %1569 = vmatprep.subr.mxu0 %v586_v41  ;;  %1576 = vmatprep.subr.mxu1 %v588_v42 }
  0xed   : > { %1570 = vmatpush3.msra.mxu0 %v586_v41  ;;  %1577 = vmatpush3.msra.mxu1 %v588_v42 }
  0xee   : > { %1571 = vmatprep.mubr.msk.f32.mxu0 %vm245_vm0, %v1788_v4  ;;  %1578 = vmatprep.mubr.msk.f32.mxu1 %vm245_vm0, %v1791_v5 }
  0xef   : > { %1581 = vmatprep.subr.mxu0 %v591_v45  ;;  %1588 = vmatprep.subr.mxu1 %v593_v43 }
  0xf0   : > { %1572 = vmatmul.mubr.msk.f32.vlgmr.msra.gmra.mxu0 %vm245_vm0, %v1794_v6  ;;  %1579 = vmatmul.mubr.msk.f32.vlgmr.msra.gmra.mxu1 %vm245_vm0, %v1797_v7 }
  0xf1   : > { %1582 = vmatpush3.msra.mxu0 %v591_v45  ;;  %1589 = vmatpush3.msra.mxu1 %v593_v43 }
  0xf2   : > { %1583 = vmatprep.subr.mxu0 %v590_v47  ;;  %1590 = vmatprep.subr.mxu1 %v592_v48 }
  0xf3   : > { %1584 = vmatpush3.msra.mxu0 %v590_v47  ;;  %1591 = vmatpush3.msra.mxu1 %v592_v48 }
  0xf4   : > { %1585 = vmatprep.mubr.msk.f32.mxu0 %vm245_vm0, %v1808_v12  ;;  %1592 = vmatprep.mubr.msk.f32.mxu1 %vm245_vm0, %v1811_v13 }
  0xf5   : > { %1586 = vmatmul.mubr.msk.f32.vlgmr.msra.gmra.mxu0 %vm245_vm0, %v1814_v14  ;;  %1593 = vmatmul.mubr.msk.f32.vlgmr.msra.gmra.mxu1 %vm245_vm0, %v1817_v15 }
 0x1a3   : > { %v1545_v49 = vpop.f32.mrf.mxu0  ;;  %v1552_v50 = vpop.f32.mrf.mxu1 }
 0x1a4   : > { %1201 = vperm.xlu0 %1637, %v1545_v49   ;;  %1211 = vperm.xlu1 %1638, %v1552_v50  }
 0x1a5   : > { %v660_v51 = vpop.f32.mrf.mxu0  ;;  %v735_v52 = vpop.f32.mrf.mxu1 }
 0x1a8   : > { %1196 = vperm.xlu0 %1637, %v660_v51   ;;  %1206 = vperm.xlu1 %1638, %v735_v52  }
 0x1aa   : > { %v1559_v53 = vpop.f32.mrf.mxu0  ;;  %v1566_v55 = vpop.f32.mrf.mxu1 }
 0x1ac   : > { %v810_v54 = vpop.f32.mrf.mxu0  ;;  %1221 = vperm.xlu1 %1638, %v1559_v53   ;;  %v885_v56 = vpop.f32.mrf.mxu1 }
 0x1ad   : > { %1216 = vperm.xlu0 %1637, %v810_v54  }
 0x1b0   : > { %v1573_v57 = vpop.f32.mrf.mxu0  ;;  %1231 = vperm.xlu1 %1638, %v1566_v55   ;;  %v1580_v59 = vpop.f32.mrf.mxu1 }
 0x1b1   : > { %1226 = vperm.xlu0 %1637, %v885_v56  }
 0x1b2   : > { %v960_v58 = vpop.f32.mrf.mxu0  ;;  %v1035_v60 = vpop.f32.mrf.mxu1 }
 0x1b4   : > { %1255 = vperm.xlu1 %1638, %v1573_v57  }
 0x1b5   : > { %1250 = vperm.xlu0 %1637, %v960_v58   ;;  %v1587_v61 = vpop.f32.mrf.mxu0  ;;  %v1594_v63 = vpop.f32.mrf.mxu1 }
 0x1b7   : > { %v1110_v62 = vpop.f32.mrf.mxu0  ;;  %v1185_v0 = vpop.f32.mrf.mxu1 }
 0x1b8   : > { %1265 = vperm.xlu1 %1638, %v1580_v59  }
 0x1b9   : > { %1260 = vperm.xlu0 %1637, %v1035_v60  }
 0x1bc   : > { %1275 = vperm.xlu1 %1638, %v1587_v61  }
 0x1bd   : > { %1270 = vperm.xlu0 %1637, %v1110_v62  }
 0x1c0   : > { %1285 = vperm.xlu1 %1638, %v1594_v63  }
 0x1c1   : > { %1280 = vperm.xlu0 %1637, %v1185_v0  }
 0x21f   : > { %v1202_v1 = vpop.permute.xlu0 %1201  ;;  %v1212_v2 = vpop.permute.xlu1 %1211 }
 0x220   : > { %v1241_v13 = vmul.f32 %v1451_v9, %v1202_v1  ;;  %v1243_v19 = vmul.f32 %v1451_v9, %v1212_v2 }
 0x223   : > { %v1197_v3 = vpop.permute.xlu0 %1196  ;;  %v1207_v4 = vpop.permute.xlu1 %1206 }
 0x224   : > { %v1240_v14 = vmul.f32 %v1451_v9, %v1197_v3  ;;  %v1242_v20 = vmul.f32 %v1451_v9, %v1207_v4 }
 0x227   : > { %v1222_v5 = vpop.permute.xlu1 %1221 }
 0x228   : > { %v1217_v6 = vpop.permute.xlu0 %1216  ;;  %v1245_v29 = vmul.f32 %v1451_v9, %v1222_v5 }
 0x229   : > { %v1244_v30 = vmul.f32 %v1451_v9, %v1217_v6 }
 0x22b   : > { %v1232_v7 = vpop.permute.xlu1 %1231 }
 0x22c   : > { %v1227_v8 = vpop.permute.xlu0 %1226  ;;  %v1247_v39 = vmul.f32 %v1451_v9, %v1232_v7 }
 0x22d   : > { %v1246_v40 = vmul.f32 %v1451_v9, %v1227_v8 }
 0x22f   : > { %v1256_v11 = vpop.permute.xlu1 %1255 }
 0x230   : > { %v1251_v12 = vpop.permute.xlu0 %1250  ;;  %v1295_v15 = vmul.f32 %v1452_v10, %v1256_v11 }
 0x231   : > { %v1294_v16 = vmul.f32 %v1452_v10, %v1251_v12 }
 0x232   : > { %v1303_v17 = vadd.f32 %v1295_v15, %v1241_v13 }
 0x233   : > { %v1302_v18 = vadd.f32 %v1294_v16, %v1240_v14  ;;  %v1266_v21 = vpop.permute.xlu1 %1265 }
 0x234   : > { %v1261_v22 = vpop.permute.xlu0 %1260  ;;  %v1311_v23 = vmax.f32 %v1303_v17, 0.0  ;;  %v1297_v25 = vmul.f32 %v1452_v10, %v1266_v21 }
 0x235   : > { %v1310_v24 = vmax.f32 %v1302_v18, 0.0  ;;  %v1296_v26 = vmul.f32 %v1452_v10, %v1261_v22 }
 0x236   : > { %1320 = vst.msk [vmem:[%s1868_s20 + $0x8] sm:$0xff] %vm1318_vm1, %v1311_v23  ;;  %v1305_v27 = vadd.f32 %v1297_v25, %v1243_v19 }
 0x237   : > { %1319 = vst.msk [vmem:[%s1868_s20] sm:$0xff] %vm1318_vm1, %v1310_v24  ;;  %v1304_v28 = vadd.f32 %v1296_v26, %v1242_v20  ;;  %v1276_v31 = vpop.permute.xlu1 %1275 }
 0x238   : > { %v1271_v32 = vpop.permute.xlu0 %1270  ;;  %v1313_v33 = vmax.f32 %v1305_v27, 0.0  ;;  %v1299_v35 = vmul.f32 %v1452_v10, %v1276_v31 }
 0x239   : > { %v1312_v34 = vmax.f32 %v1304_v28, 0.0  ;;  %v1298_v36 = vmul.f32 %v1452_v10, %v1271_v32 }
 0x23a   : > { %1322 = vst.msk [vmem:[%s1868_s20 + $0x18] sm:$0xff] %vm1318_vm1, %v1313_v33  ;;  %v1307_v37 = vadd.f32 %v1299_v35, %v1245_v29 }
 0x23b   : > { %1321 = vst.msk [vmem:[%s1868_s20 + $0x10] sm:$0xff] %vm1318_vm1, %v1312_v34  ;;  %v1306_v38 = vadd.f32 %v1298_v36, %v1244_v30  ;;  %v1286_v41 = vpop.permute.xlu1 %1285 }
 0x23c   : > { %v1281_v42 = vpop.permute.xlu0 %1280  ;;  %v1315_v43 = vmax.f32 %v1307_v37, 0.0  ;;  %v1301_v45 = vmul.f32 %v1452_v10, %v1286_v41 }
 0x23d   : > { %v1314_v44 = vmax.f32 %v1306_v38, 0.0  ;;  %v1300_v46 = vmul.f32 %v1452_v10, %v1281_v42 }
 0x23e   : > { %1324 = vst.msk [vmem:[%s1868_s20 + $0x28] sm:$0xff] %vm1318_vm1, %v1315_v43  ;;  %v1309_v47 = vadd.f32 %v1301_v45, %v1247_v39 }
 0x23f   : > { %1323 = vst.msk [vmem:[%s1868_s20 + $0x20] sm:$0xff] %vm1318_vm1, %v1314_v44  ;;  %v1308_v48 = vadd.f32 %v1300_v46, %v1246_v40 }
 0x240   : > { %v1317_v49 = vmax.f32 %v1309_v47, 0.0 }
 0x241   : > { %v1316_v50 = vmax.f32 %v1308_v48, 0.0 }
 0x242   : > { %1326 = vst.msk [vmem:[%s1868_s20 + $0x38] sm:$0xff] %vm1318_vm1, %v1317_v49 }
 0x243   : > { %1325 = vst.msk [vmem:[%s1868_s20 + $0x30] sm:$0xff] %vm1318_vm1, %v1316_v50 }
 0x244   : > { %1652 = shalt.err (!%p1649_p3)
}
 0x245   : > { %s1653_s8 = scalar_lea.hbm %s1887_s29, 1024  ;;  %s1657_s11 = scalar_lea.hbm %s1941_s4, 2048 }
 0x246   : > { %p1654_p4 = scmp.ne.s32.totalorder %s1887_s29, %s1653_s8  ;;  %p1658_p9 = scmp.lt.s32.totalorder %s1887_s29, %s1941_s4 }
 0x247   : > { %p1659_p10 = scmp.lt.s32.totalorder %s1657_s11, %s1653_s8 }
 0x248   : > { %p1655_p7 = pnand %p1654_p4, %p1768_p5 }
 0x249   : > { %p1660_p11 = por %p1659_p10, %p1658_p9 }
 0x24a   : > { %p1656_p8 = pneg %p1655_p7 }
 0x24c   : > { %p1661_p12 = pnand %p1660_p11, %p1656_p8 }
 0x24e   : > { %1664 = shalt.err (!%p1661_p12)
}
 0x24f   : > { %s1703_s14 = smov 128   ;;  %s1704_s20 = smov 8  }
 0x250   : > { %1595 = dma.vmem_to_hbm [thread:$0]  (%p1768_p5), %s1889_s23, 1024, %s1887_s29, %s1897_s19, %s1703_s14, %s1703_s14, %s1704_s20  }
 0x251 PF: > { %p1601_p13 = scmp.ge.s32.totalorder %s1699_s18, 2  ;;  %s1357_s22 = sand.u32 1, %s1687_s15  }
 0x252   : > { %s1358_s27 = scalar_lea.sflag [#allocation3], %s1357_s22 }
 0x253   : > { %p1598_p0 = pnand %p1601_p13, %p1772_p6 }
 0x255   : > { %p1599_p1 = pneg %p1598_p0 }
 0x257   : > { %1682 = dma.done.wait (%p1599_p1), %s1358_s27, 1024  }
 0x258   : > { %1684 = vsyncadd (%p1599_p1), %s1358_s27, 4294966272  ;;  %p14_p2 = scmp.ge.s32.totalorder %s1755_s21, 4   ;;  %s1944_s15 = smov %s1691_s16 }
 0x259   : > { %s1945_s16 = smov %s1695_s17  ;;  %s1946_s17 = smov %s1766_s24 }
 0x25a   : > { %s1947_s18 = smov %s1755_s21  ;;  %16 = sbr.rel (!%p14_p2) target bundleno = 3 (0x3), region = 74 }
 0x25f   :  { %1363 = vsyncpa [#allocation3], 1 }
 0x260   :  { %1365 = vsyncpa [#allocation3 + $0x1], 1 }

</bundles_post_ra>
